<compile_context>
chip_gen: v7x
topology: tpu7x:2x2x1
jax: 0.10.0
libtpu: 0.0.40
codegen_flags: <defaults>
</compile_context>

<pallas_src>
import functools
import math

import jax
import jax.numpy as jnp
from jax import lax
from jax.experimental import pallas as pl
from jax.experimental.pallas import tpu as pltpu

BETA_CLUSTERING_LOSS = 0.3  # cfg.ADAPTER.SHOT.beta_clustering_loss (> 0)
STEPS = 1                   # cfg.OPTIM.STEPS

_LANE = 128
_SUBLANE_BF16 = 16


def _round_up(x, m):
    return ((x + m - 1) // m) * m


def _vmem_limit_bytes():
    """Generation-aware scoped-VMEM limit (~75% of physical VMEM)."""
    try:
        cap = int(pltpu.get_tpu_info().vmem_capacity_bytes)
    except Exception:
        cap = 64 * 1024 * 1024  # conservative (v7x physical VMEM)
    return (cap * 3) // 4       # ~48 MiB on v7x, ~96 MiB on v5e/v6e


def _make_epilogue(b_real, num_classes, beta):
    """SHOT epilogue on in-VMEM values: softmax / entropy / diversity / centroid
    pseudo-labels / cross-entropy.  feats is [Bp, D] f32 (bias already added)."""

    def epilogue(feats, w2, b2):
        # Tiny logits matmul kept in f32 (review): Bp x D x K is essentially free.
        outputs = jnp.dot(feats, w2, preferred_element_type=jnp.float32) + b2  # [Bp, K]

        Bp, K = outputs.shape
        inv_b = 1.0 / float(b_real)

        # Mask for zero-padded batch rows (they contribute nothing to reductions).
        row_ids = lax.broadcasted_iota(jnp.int32, (Bp, 1), 0)
        mask = (row_ids < b_real).astype(jnp.float32)                  # [Bp, 1]

        # ---- softmax over classes (dim=1), exact reciprocal for reference parity ----
        m = jnp.max(outputs, axis=1, keepdims=True)
        e = jnp.exp(outputs - m)
        z = jnp.sum(e, axis=1, keepdims=True)
        softmax_out = e / z                                            # [Bp, K]
        log_softmax = (outputs - m) - jnp.log(z)                       # [Bp, K]

        # ---- entropy + diversity losses (masked batch reductions) ----
        msoftmax = jnp.sum(softmax_out * mask, axis=0, keepdims=True) * inv_b
        l_ent = -jnp.sum(mask * softmax_out * jnp.log(softmax_out + 1e-5)) * inv_b
        l_div = jnp.sum(msoftmax * jnp.log(msoftmax + 1e-5))
        loss = l_ent + l_div

        # ---- L2-normalize features along dim=1 (rsqrt on the EUP) ----
        sumsq = jnp.sum(feats * feats, axis=1, keepdims=True)
        features = feats * lax.rsqrt(sumsq + 1e-30)                    # [Bp, D]

        cls_iota = lax.broadcasted_iota(jnp.int32, (Bp, K), 1)

        def pseudo_labels(aff):
            # Centroids kept transposed as [D, K] so everything stays lane-aligned.
            cent_t = jnp.einsum('bk,bd->dk', aff, features,
                                preferred_element_type=jnp.float32)    # [D, K]
            denom = jnp.sum(aff, axis=0, keepdims=True)                # [1, K]
            cent_t = cent_t * pl.reciprocal(denom + 1e-8, approx=True)  # EUP reciprocal
            # argmin_k ||f - c_k|| == argmin_k (|c_k|^2 - 2 f.c_k): sqrt is monotone
            # and |f|^2 is constant per row, so both are dropped.
            csq = jnp.sum(cent_t * cent_t, axis=0, keepdims=True)      # [1, K]
            cross = jnp.dot(features, cent_t,
                            preferred_element_type=jnp.float32)        # [Bp, K]
            score = csq - 2.0 * cross
            mins = jnp.min(score, axis=1, keepdims=True)
            cand = jnp.where(score <= mins, cls_iota, num_classes)     # first min index
            return jnp.min(cand, axis=1, keepdims=True)                # [Bp, 1] int32

        # initial pseudo-labels from soft (masked) affinities
        labels = pseudo_labels(softmax_out * mask)
        # one refinement iteration with hard one-hot affinities
        aff_hard = (cls_iota == labels).astype(jnp.float32) * mask
        labels = pseudo_labels(aff_hard)

        # ---- cross-entropy(outputs, pseudo_labels) ----
        onehot = (cls_iota == labels).astype(jnp.float32)
        ce = -jnp.sum(mask * onehot * log_softmax) * inv_b
        loss = loss + beta * ce
        return outputs, loss

    return epilogue


def make_shot_kernel_single(b_real, num_classes, beta):
    """Single-shot kernel: whole x / w1 resident in VMEM, no grid, no accumulator."""
    epilogue = _make_epilogue(b_real, num_classes, beta)

    def kernel(x_ref, w1_ref, b1_ref, w2_ref, b2_ref, out_ref, loss_ref):
        feats = jnp.dot(x_ref[...], w1_ref[...],
                        preferred_element_type=jnp.float32) + b1_ref[...]   # [Bp, D] f32
        outputs, loss = epilogue(feats, w2_ref[...], b2_ref[...])
        out_ref[...] = outputs.astype(out_ref.dtype)
        loss_ref[0, 0] = loss

    return kernel


def make_shot_kernel_tiled(b_real, num_classes, beta):
    """F-tiled kernel: feats accumulated over the (reduction) F grid axis."""
    epilogue = _make_epilogue(b_real, num_classes, beta)

    def kernel(x_ref, w1_ref, b1_ref, w2_ref, b2_ref, out_ref, loss_ref, feats_acc):
        f = pl.program_id(0)

        @pl.when(f == 0)
        def _():
            feats_acc[...] = jnp.zeros_like(feats_acc)

        # x block arrives squeezed to (Bp, tF) — one contiguous HBM region per step.
        feats_acc[...] += jnp.dot(x_ref[...], w1_ref[...],
                                  preferred_element_type=jnp.float32)

        @pl.when(f == pl.num_programs(0) - 1)
        def _():
            feats = feats_acc[...] + b1_ref[...]
            outputs, loss = epilogue(feats, w2_ref[...], b2_ref[...])
            out_ref[...] = outputs.astype(out_ref.dtype)
            loss_ref[0, 0] = loss

    return kernel


def shot_forward(x, w1, b1, w2, b2, *, beta=BETA_CLUSTERING_LOSS, tile_f=None):
    """One SHOT forward_and_adapt step: returns (outputs [B, K], adaptation loss)."""
    B = x.shape[0]
    F_in = math.prod(x.shape[1:])
    D = w1.shape[1]
    K = w2.shape[1]

    Bp = _round_up(B, _SUBLANE_BF16)          # sublane / bf16-pack friendly batch
    D_lanes = _round_up(D, _LANE)             # lane padding of the narrow D dim in VMEM
    K_lanes = _round_up(K, _LANE)
    F128 = _round_up(F_in, _LANE)

    vmem_limit = _vmem_limit_bytes()
    # Resident (non-streamed) VMEM with lane padding: b1, w2, b2, outputs, feats acc.
    resident = (D_lanes * 4 + D * K_lanes * 4 + K_lanes * 4
                + Bp * K_lanes * 4 + Bp * D_lanes * 4)
    avail = max(vmem_limit - resident, 4 * 1024 * 1024)
    stream_budget = int(avail * 0.9)          # headroom for compiler-internal scratch

    # Single bf16 cast of x in the wrapper; weights should be pre-cast by the caller.
    x_flat = x.reshape(B, F_in)
    if x_flat.dtype != jnp.bfloat16:
        x_flat = x_flat.astype(jnp.bfloat16)
    w1_b = w1 if w1.dtype == jnp.bfloat16 else w1.astype(jnp.bfloat16)
    w2_f = w2.astype(jnp.float32)             # tiny f32 epilogue matmul (review)
    b1_f = b1.reshape(1, D).astype(jnp.float32)
    b2_f = b2.reshape(1, K).astype(jnp.float32)

    # ---- decide single-shot vs F-tiled from the real (lane-padded) VMEM budget ----
    if tile_f is not None:
        tF = max(_LANE, _round_up(int(tile_f), _LANE))
        single_shot = tF >= F128
    else:
        single_bytes = F128 * (Bp + D_lanes) * 2      # whole-F working set, single buffer
        single_shot = single_bytes <= stream_budget
        tF = None

    out_shape = (jax.ShapeDtypeStruct((Bp, K), jnp.float32),
                 jax.ShapeDtypeStruct((1, 1), jnp.float32))

    if single_shot:
        # --- no grid: whole x / w1 in VMEM, no accumulator, no pl.when gates ---
        if F128 != F_in:
            x_p = jnp.zeros((Bp, F128), jnp.bfloat16).at[:B, :F_in].set(x_flat)
            w1_p = jnp.zeros((F128, D), jnp.bfloat16).at[:F_in, :].set(w1_b)
        else:
            w1_p = w1_b                                  # no padded copy of w1
            x_p = (x_flat if Bp == B else
                   jnp.zeros((Bp, F_in), jnp.bfloat16).at[:B, :].set(x_flat))
        Fp = x_p.shape[1]

        kernel = make_shot_kernel_single(B, K, float(beta))
        flops = 2 * Bp * Fp * D + 10 * Bp * D * K
        transcendentals = 4 * Bp * K + Bp
        bytes_accessed = (Bp * Fp + Fp * D) * 2 + (D + D * K + K + Bp * K + 1) * 4

        outputs_p, loss = pl.pallas_call(
            kernel,
            out_shape=out_shape,
            in_specs=[pl.BlockSpec(memory_space=pltpu.MemorySpace.VMEM)] * 5,
            out_specs=(pl.BlockSpec(memory_space=pltpu.MemorySpace.VMEM),
                       pl.BlockSpec(memory_space=pltpu.MemorySpace.SMEM)),
            compiler_params=pltpu.CompilerParams(vmem_limit_bytes=vmem_limit),
            cost_estimate=pl.CostEstimate(flops=int(flops),
                                          transcendentals=int(transcendentals),
                                          bytes_accessed=int(bytes_accessed)),
        )(x_p, w1_p, b1_f, w2_f, b2_f)
        return outputs_p[:B], loss[0, 0]

    # --- F-tiled path: reduction grid over F, VMEM feats accumulator ---
    if tF is None:
        # Largest tF (multiple of 128) whose double-buffered x + w1 blocks
        # (lane-padded) fit the streaming budget.
        per_col = 2 * 2 * (Bp + D_lanes)                 # bytes per F column, x2 buffers
        tF = max(_LANE, (stream_budget // per_col) // _LANE * _LANE)
    tF = min(tF, F128)
    if F_in % _LANE == 0:
        # Prefer a tile that divides F exactly so no padded w1/x copy is needed.
        while F_in % tF != 0:
            tF -= _LANE
    Fp = _round_up(F_in, tF)
    nF = Fp // tF

    if Fp != F_in or Bp != B:
        x_pad = jnp.zeros((Bp, Fp), jnp.bfloat16).at[:B, :F_in].set(x_flat)
    else:
        x_pad = x_flat
    # (nF, Bp, tF) layout: each grid step's x block is one contiguous HBM region.
    x_p = x_pad.reshape(Bp, nF, tF).transpose(1, 0, 2)
    w1_p = w1_b if Fp == F_in else jnp.zeros((Fp, D), jnp.bfloat16).at[:F_in, :].set(w1_b)

    kernel = make_shot_kernel_tiled(B, K, float(beta))

    grid_spec = pltpu.PrefetchScalarGridSpec(
        num_scalar_prefetch=0,
        grid=(nF,),
        in_specs=[
            pl.BlockSpec((None, Bp, tF), lambda f: (f, 0, 0)),  # x block (contiguous DMA)
            pl.BlockSpec((tF, D), lambda f: (f, 0)),            # w1 block (row-contiguous)
            pl.BlockSpec((1, D), lambda f: (0, 0)),             # b1 (resident)
            pl.BlockSpec((D, K), lambda f: (0, 0)),             # w2 (resident)
            pl.BlockSpec((1, K), lambda f: (0, 0)),             # b2 (resident)
        ],
        out_specs=(
            pl.BlockSpec((Bp, K), lambda f: (0, 0)),            # outputs (resident)
            pl.BlockSpec(memory_space=pltpu.MemorySpace.SMEM),  # scalar loss
        ),
        scratch_shapes=[pltpu.VMEM((Bp, D), jnp.float32)],      # feats accumulator
    )

    flops = 2 * Bp * Fp * D + 10 * Bp * D * K
    transcendentals = 4 * Bp * K + Bp
    bytes_accessed = (Bp * Fp + Fp * D) * 2 + (D + D * K + K + Bp * K + 1) * 4

    outputs_p, loss = pl.pallas_call(
        kernel,
        out_shape=out_shape,
        grid_spec=grid_spec,
        compiler_params=pltpu.CompilerParams(
            dimension_semantics=("arbitrary",),      # F is a reduction axis
            vmem_limit_bytes=vmem_limit,
        ),
        cost_estimate=pl.CostEstimate(flops=int(flops),
                                      transcendentals=int(transcendentals),
                                      bytes_accessed=int(bytes_accessed)),
    )(x_p, w1_p, b1_f, w2_f, b2_f)
    return outputs_p[:B], loss[0, 0]


if __name__ == "__main__":
    key = jax.random.PRNGKey(0)
    kx, k1, k2 = jax.random.split(key, 3)

    B, C, H, W = 2, 4, 16, 16     # input x: NCHW
    D, K = 32, 8                  # feature dim, num classes
    F_in = C * H * W

    x = jax.random.normal(kx, (B, C, H, W), dtype=jnp.float32)
    w1 = jax.random.normal(k1, (F_in, D), dtype=jnp.float32) * 0.02
    b1 = jnp.zeros((1, D), dtype=jnp.float32)
    w2 = jax.random.normal(k2, (D, K), dtype=jnp.float32) * 0.1
    b2 = jnp.zeros((1, K), dtype=jnp.float32)

    # Hoist the bf16 cast of the streamed weight out of the per-step path (review).
    w1_bf16 = w1.astype(jnp.bfloat16)

    shot_step = jax.jit(shot_forward)

    outputs = loss = None
    for _ in range(STEPS):
        # TODO(synk): parameters are not updated between steps (no optimizer.step()).
        outputs, loss = shot_step(x, w1_bf16, b1, w2, b2)
    jax.block_until_ready((outputs, loss))

    # Also exercise the F-tiled reduction path (used when F is too large for VMEM)
    # and cross-check it against the single-shot result.
    shot_step_tiled = jax.jit(functools.partial(shot_forward, tile_f=256))
    outputs_t, loss_t = shot_step_tiled(x, w1_bf16, b1, w2, b2)
    jax.block_until_ready((outputs_t, loss_t))

    assert jnp.allclose(outputs, outputs_t, atol=5e-2, rtol=5e-2), "tiled/single mismatch"
    assert jnp.allclose(loss, loss_t, atol=5e-2, rtol=5e-2), "tiled/single loss mismatch"

    print("KERNEL_OK")
</pallas_src>

<mosaic_0001>
module attributes {stable_mosaic.version = 11 : i64} {
  func.func @kernel(%arg0: memref<16x1024xbf16, #tpu.memory_space<vmem>>, %arg1: memref<1024x32xbf16, #tpu.memory_space<vmem>>, %arg2: memref<1x32xf32, #tpu.memory_space<vmem>>, %arg3: memref<32x8xf32, #tpu.memory_space<vmem>>, %arg4: memref<1x8xf32, #tpu.memory_space<vmem>>, %arg5: memref<16x8xf32, #tpu.memory_space<vmem>>, %arg6: memref<1x1xf32, #tpu.memory_space<smem>>) attributes {dimension_semantics = [], scalar_prefetch = 0 : i64, scratch_operands = 0 : i64, tpu.core_type = #tpu.core_type<tc>} {
    %c0 = arith.constant 0 : index
    %c0_0 = arith.constant 0 : index
    %0 = vector.load %arg0[%c0, %c0_0] : memref<16x1024xbf16, #tpu.memory_space<vmem>>, vector<16x1024xbf16>
    %c0_1 = arith.constant 0 : index
    %c0_2 = arith.constant 0 : index
    %1 = vector.load %arg1[%c0_1, %c0_2] : memref<1024x32xbf16, #tpu.memory_space<vmem>>, vector<1024x32xbf16>
    %cst = arith.constant dense<0.000000e+00> : vector<16x32xf32>
    %2 = tpu.matmul %0, %1, %cst {dimension_numbers = #tpu.dot_dimension_numbers<[1], [0], [0], [1], [0, 0, 1, 1], [], []>} : vector<16x1024xbf16>, vector<1024x32xbf16>, vector<16x32xf32> -> vector<16x32xf32>
    %c0_3 = arith.constant 0 : index
    %c0_4 = arith.constant 0 : index
    %3 = vector.load %arg2[%c0_3, %c0_4] : memref<1x32xf32, #tpu.memory_space<vmem>>, vector<1x32xf32>
    %4 = vector.broadcast %3 : vector<1x32xf32> to vector<16x32xf32>
    %5 = arith.addf %2, %4 : vector<16x32xf32>
    %c0_5 = arith.constant 0 : index
    %c0_6 = arith.constant 0 : index
    %6 = vector.load %arg3[%c0_5, %c0_6] : memref<32x8xf32, #tpu.memory_space<vmem>>, vector<32x8xf32>
    %c0_7 = arith.constant 0 : index
    %c0_8 = arith.constant 0 : index
    %7 = vector.load %arg4[%c0_7, %c0_8] : memref<1x8xf32, #tpu.memory_space<vmem>>, vector<1x8xf32>
    %cst_9 = arith.constant dense<0.000000e+00> : vector<16x8xf32>
    %8 = tpu.matmul %5, %6, %cst_9 {dimension_numbers = #tpu.dot_dimension_numbers<[1], [0], [0], [1], [0, 0, 1, 1], [], []>} : vector<16x32xf32>, vector<32x8xf32>, vector<16x8xf32> -> vector<16x8xf32>
    %9 = vector.broadcast %7 : vector<1x8xf32> to vector<16x8xf32>
    %10 = arith.addf %8, %9 : vector<16x8xf32>
    %11 = tpu.iota {dimensions = array<i32: 0>} : vector<16x1xi32>
    %c2_i32 = arith.constant 2 : i32
    %12 = vector.broadcast %c2_i32 : i32 to vector<16x1xi32>
    %13 = arith.cmpi slt, %11, %12 : vector<16x1xi32>
    %14 = arith.extui %13 : vector<16x1xi1> to vector<16x1xi32>
    %15 = arith.sitofp %14 : vector<16x1xi32> to vector<16x1xf32>
    %cst_10 = arith.constant dense<0xFF800000> : vector<16xf32>
    %16 = vector.multi_reduction <maximumf>, %10, %cst_10 [1] : vector<16x8xf32> to vector<16xf32>
    %17 = vector.shape_cast %16 : vector<16xf32> to vector<16x1xf32>
    %18 = vector.broadcast %17 : vector<16x1xf32> to vector<16x8xf32>
    %19 = arith.subf %10, %18 : vector<16x8xf32>
    %20 = math.exp %19 : vector<16x8xf32>
    %cst_11 = arith.constant dense<0.000000e+00> : vector<16xf32>
    %21 = vector.multi_reduction <add>, %20, %cst_11 [1] : vector<16x8xf32> to vector<16xf32>
    %22 = vector.shape_cast %21 : vector<16xf32> to vector<16x1xf32>
    %23 = vector.broadcast %22 : vector<16x1xf32> to vector<16x8xf32>
    %24 = arith.divf %20, %23 : vector<16x8xf32>
    %25 = vector.broadcast %17 : vector<16x1xf32> to vector<16x8xf32>
    %26 = arith.subf %10, %25 : vector<16x8xf32>
    %27 = math.log %22 : vector<16x1xf32>
    %28 = vector.broadcast %27 : vector<16x1xf32> to vector<16x8xf32>
    %29 = arith.subf %26, %28 : vector<16x8xf32>
    %30 = vector.broadcast %15 : vector<16x1xf32> to vector<16x8xf32>
    %31 = arith.mulf %24, %30 : vector<16x8xf32>
    %cst_12 = arith.constant dense<0.000000e+00> : vector<8xf32>
    %32 = vector.multi_reduction <add>, %31, %cst_12 [0] : vector<16x8xf32> to vector<8xf32>
    %33 = vector.shape_cast %32 : vector<8xf32> to vector<1x8xf32>
    %cst_13 = arith.constant 5.000000e-01 : f32
    %34 = vector.broadcast %cst_13 : f32 to vector<1x8xf32>
    %35 = arith.mulf %33, %34 : vector<1x8xf32>
    %36 = vector.broadcast %15 : vector<16x1xf32> to vector<16x8xf32>
    %37 = arith.mulf %36, %24 : vector<16x8xf32>
    %cst_14 = arith.constant 9.99999974E-6 : f32
    %38 = vector.broadcast %cst_14 : f32 to vector<16x8xf32>
    %39 = arith.addf %24, %38 : vector<16x8xf32>
    %40 = math.log %39 : vector<16x8xf32>
    %41 = arith.mulf %37, %40 : vector<16x8xf32>
    %42 = vector.shape_cast %41 : vector<16x8xf32> to vector<1x16x8xf32>
    %cst_15 = arith.constant dense<0.000000e+00> : vector<1xf32>
    %43 = vector.multi_reduction <add>, %42, %cst_15 [1, 2] : vector<1x16x8xf32> to vector<1xf32>
    %44 = vector.shape_cast %43 : vector<1xf32> to vector<1x1x1xf32>
    %45 = vector.extract %44[0, 0, 0] : f32 from vector<1x1x1xf32>
    %cst_16 = arith.constant 0.000000e+00 : f32
    %46 = arith.subf %cst_16, %45 : f32
    %cst_17 = arith.constant 5.000000e-01 : f32
    %47 = arith.mulf %46, %cst_17 : f32
    %cst_18 = arith.constant 9.99999974E-6 : f32
    %48 = vector.broadcast %cst_18 : f32 to vector<1x8xf32>
    %49 = arith.addf %35, %48 : vector<1x8xf32>
    %50 = math.log %49 : vector<1x8xf32>
    %51 = arith.mulf %35, %50 : vector<1x8xf32>
    %52 = vector.shape_cast %51 : vector<1x8xf32> to vector<1x1x8xf32>
    %cst_19 = arith.constant dense<0.000000e+00> : vector<1xf32>
    %53 = vector.multi_reduction <add>, %52, %cst_19 [1, 2] : vector<1x1x8xf32> to vector<1xf32>
    %54 = vector.shape_cast %53 : vector<1xf32> to vector<1x1x1xf32>
    %55 = vector.extract %54[0, 0, 0] : f32 from vector<1x1x1xf32>
    %56 = arith.addf %47, %55 : f32
    %57 = arith.mulf %5, %5 : vector<16x32xf32>
    %cst_20 = arith.constant dense<0.000000e+00> : vector<16xf32>
    %58 = vector.multi_reduction <add>, %57, %cst_20 [1] : vector<16x32xf32> to vector<16xf32>
    %59 = vector.shape_cast %58 : vector<16xf32> to vector<16x1xf32>
    %cst_21 = arith.constant 1.000000e-30 : f32
    %60 = vector.broadcast %cst_21 : f32 to vector<16x1xf32>
    %61 = arith.addf %59, %60 : vector<16x1xf32>
    %62 = math.rsqrt %61 : vector<16x1xf32>
    %63 = vector.broadcast %62 : vector<16x1xf32> to vector<16x32xf32>
    %64 = arith.mulf %5, %63 : vector<16x32xf32>
    %65 = tpu.iota {dimensions = array<i32: 1>} : vector<16x8xi32>
    %66 = vector.broadcast %15 : vector<16x1xf32> to vector<16x8xf32>
    %67 = arith.mulf %24, %66 : vector<16x8xf32>
    "tpu.trace_start"() <{level = 10 : i32, message = "bk,bd->dk"}> : () -> ()
    %cst_22 = arith.constant dense<0.000000e+00> : vector<32x8xf32>
    %68 = tpu.matmul %64, %67, %cst_22 {dimension_numbers = #tpu.dot_dimension_numbers<[0], [0], [1], [1], [0, 1, 1, 1], [], []>} : vector<16x32xf32>, vector<16x8xf32>, vector<32x8xf32> -> vector<32x8xf32>
    "tpu.trace_stop"() : () -> ()
    %cst_23 = arith.constant dense<0.000000e+00> : vector<8xf32>
    %69 = vector.multi_reduction <add>, %67, %cst_23 [0] : vector<16x8xf32> to vector<8xf32>
    %70 = vector.shape_cast %69 : vector<8xf32> to vector<1x8xf32>
    %cst_24 = arith.constant 9.99999993E-9 : f32
    %71 = vector.broadcast %cst_24 : f32 to vector<1x8xf32>
    %72 = arith.addf %70, %71 : vector<1x8xf32>
    %73 = tpu.reciprocal %72 {approx = true} : vector<1x8xf32> -> vector<1x8xf32>
    %74 = vector.broadcast %73 : vector<1x8xf32> to vector<32x8xf32>
    %75 = arith.mulf %68, %74 : vector<32x8xf32>
    %76 = arith.mulf %75, %75 : vector<32x8xf32>
    %cst_25 = arith.constant dense<0.000000e+00> : vector<8xf32>
    %77 = vector.multi_reduction <add>, %76, %cst_25 [0] : vector<32x8xf32> to vector<8xf32>
    %78 = vector.shape_cast %77 : vector<8xf32> to vector<1x8xf32>
    %cst_26 = arith.constant dense<0.000000e+00> : vector<16x8xf32>
    %79 = tpu.matmul %64, %75, %cst_26 {dimension_numbers = #tpu.dot_dimension_numbers<[1], [0], [0], [1], [0, 0, 1, 1], [], []>} : vector<16x32xf32>, vector<32x8xf32>, vector<16x8xf32> -> vector<16x8xf32>
    %cst_27 = arith.constant 2.000000e+00 : f32
    %80 = vector.broadcast %cst_27 : f32 to vector<16x8xf32>
    %81 = arith.mulf %80, %79 : vector<16x8xf32>
    %82 = vector.broadcast %78 : vector<1x8xf32> to vector<16x8xf32>
    %83 = arith.subf %82, %81 : vector<16x8xf32>
    %cst_28 = arith.constant dense<0x7F800000> : vector<16xf32>
    %84 = vector.multi_reduction <minimumf>, %83, %cst_28 [1] : vector<16x8xf32> to vector<16xf32>
    %85 = vector.shape_cast %84 : vector<16xf32> to vector<16x1xf32>
    %86 = vector.broadcast %85 : vector<16x1xf32> to vector<16x8xf32>
    %87 = arith.cmpf ole, %83, %86 : vector<16x8xf32>
    %c8_i32 = arith.constant 8 : i32
    %88 = vector.broadcast %c8_i32 : i32 to vector<16x8xi32>
    %89 = arith.select %87, %65, %88 : vector<16x8xi1>, vector<16x8xi32>
    %cst_29 = arith.constant dense<2147483647> : vector<16xi32>
    %90 = vector.multi_reduction <minsi>, %89, %cst_29 [1] : vector<16x8xi32> to vector<16xi32>
    %91 = vector.shape_cast %90 : vector<16xi32> to vector<16x1xi32>
    %92 = vector.broadcast %91 : vector<16x1xi32> to vector<16x8xi32>
    %93 = arith.cmpi eq, %65, %92 : vector<16x8xi32>
    %94 = arith.extui %93 : vector<16x8xi1> to vector<16x8xi32>
    %95 = arith.sitofp %94 : vector<16x8xi32> to vector<16x8xf32>
    %96 = vector.broadcast %15 : vector<16x1xf32> to vector<16x8xf32>
    %97 = arith.mulf %95, %96 : vector<16x8xf32>
    "tpu.trace_start"() <{level = 10 : i32, message = "bk,bd->dk"}> : () -> ()
    %cst_30 = arith.constant dense<0.000000e+00> : vector<32x8xf32>
    %98 = tpu.matmul %64, %97, %cst_30 {dimension_numbers = #tpu.dot_dimension_numbers<[0], [0], [1], [1], [0, 1, 1, 1], [], []>} : vector<16x32xf32>, vector<16x8xf32>, vector<32x8xf32> -> vector<32x8xf32>
    "tpu.trace_stop"() : () -> ()
    %cst_31 = arith.constant dense<0.000000e+00> : vector<8xf32>
    %99 = vector.multi_reduction <add>, %97, %cst_31 [0] : vector<16x8xf32> to vector<8xf32>
    %100 = vector.shape_cast %99 : vector<8xf32> to vector<1x8xf32>
    %cst_32 = arith.constant 9.99999993E-9 : f32
    %101 = vector.broadcast %cst_32 : f32 to vector<1x8xf32>
    %102 = arith.addf %100, %101 : vector<1x8xf32>
    %103 = tpu.reciprocal %102 {approx = true} : vector<1x8xf32> -> vector<1x8xf32>
    %104 = vector.broadcast %103 : vector<1x8xf32> to vector<32x8xf32>
    %105 = arith.mulf %98, %104 : vector<32x8xf32>
    %106 = arith.mulf %105, %105 : vector<32x8xf32>
    %cst_33 = arith.constant dense<0.000000e+00> : vector<8xf32>
    %107 = vector.multi_reduction <add>, %106, %cst_33 [0] : vector<32x8xf32> to vector<8xf32>
    %108 = vector.shape_cast %107 : vector<8xf32> to vector<1x8xf32>
    %cst_34 = arith.constant dense<0.000000e+00> : vector<16x8xf32>
    %109 = tpu.matmul %64, %105, %cst_34 {dimension_numbers = #tpu.dot_dimension_numbers<[1], [0], [0], [1], [0, 0, 1, 1], [], []>} : vector<16x32xf32>, vector<32x8xf32>, vector<16x8xf32> -> vector<16x8xf32>
    %cst_35 = arith.constant 2.000000e+00 : f32
    %110 = vector.broadcast %cst_35 : f32 to vector<16x8xf32>
    %111 = arith.mulf %110, %109 : vector<16x8xf32>
    %112 = vector.broadcast %108 : vector<1x8xf32> to vector<16x8xf32>
    %113 = arith.subf %112, %111 : vector<16x8xf32>
    %cst_36 = arith.constant dense<0x7F800000> : vector<16xf32>
    %114 = vector.multi_reduction <minimumf>, %113, %cst_36 [1] : vector<16x8xf32> to vector<16xf32>
    %115 = vector.shape_cast %114 : vector<16xf32> to vector<16x1xf32>
    %116 = vector.broadcast %115 : vector<16x1xf32> to vector<16x8xf32>
    %117 = arith.cmpf ole, %113, %116 : vector<16x8xf32>
    %c8_i32_37 = arith.constant 8 : i32
    %118 = vector.broadcast %c8_i32_37 : i32 to vector<16x8xi32>
    %119 = arith.select %117, %65, %118 : vector<16x8xi1>, vector<16x8xi32>
    %cst_38 = arith.constant dense<2147483647> : vector<16xi32>
    %120 = vector.multi_reduction <minsi>, %119, %cst_38 [1] : vector<16x8xi32> to vector<16xi32>
    %121 = vector.shape_cast %120 : vector<16xi32> to vector<16x1xi32>
    %122 = vector.broadcast %121 : vector<16x1xi32> to vector<16x8xi32>
    %123 = arith.cmpi eq, %65, %122 : vector<16x8xi32>
    %124 = arith.extui %123 : vector<16x8xi1> to vector<16x8xi32>
    %125 = arith.sitofp %124 : vector<16x8xi32> to vector<16x8xf32>
    %126 = vector.broadcast %15 : vector<16x1xf32> to vector<16x8xf32>
    %127 = arith.mulf %126, %125 : vector<16x8xf32>
    %128 = arith.mulf %127, %29 : vector<16x8xf32>
    %129 = vector.shape_cast %128 : vector<16x8xf32> to vector<1x16x8xf32>
    %cst_39 = arith.constant dense<0.000000e+00> : vector<1xf32>
    %130 = vector.multi_reduction <add>, %129, %cst_39 [1, 2] : vector<1x16x8xf32> to vector<1xf32>
    %131 = vector.shape_cast %130 : vector<1xf32> to vector<1x1x1xf32>
    %132 = vector.extract %131[0, 0, 0] : f32 from vector<1x1x1xf32>
    %cst_40 = arith.constant 0.000000e+00 : f32
    %133 = arith.subf %cst_40, %132 : f32
    %cst_41 = arith.constant 5.000000e-01 : f32
    %134 = arith.mulf %133, %cst_41 : f32
    %cst_42 = arith.constant 3.000000e-01 : f32
    %135 = arith.mulf %cst_42, %134 : f32
    %136 = arith.addf %56, %135 : f32
    %c0_43 = arith.constant 0 : index
    %c0_44 = arith.constant 0 : index
    %137 = vector.load %arg5[%c0_43, %c0_44] : memref<16x8xf32, #tpu.memory_space<vmem>>, vector<16x8xf32>
    tpu.vector_store %arg5[%c0_43, %c0_44], %10 {strides = array<i32>} : memref<16x8xf32, #tpu.memory_space<vmem>>, vector<16x8xf32>,
    %c0_45 = arith.constant 0 : index
    %c0_46 = arith.constant 0 : index
    %138 = memref.load %arg6[%c0_45, %c0_46] : memref<1x1xf32, #tpu.memory_space<smem>>
    memref.store %136, %arg6[%c0_45, %c0_46] : memref<1x1xf32, #tpu.memory_space<smem>>
    return
  }
}

</mosaic_0001>

<bundles_post_ra>
// kernel: shot_forward.1
= control target key start
LH: loop header
LB: loop body
LE: loop exit
PB: predicated region body
PF: predicated region fallthrough
CT: control target
= control target key end

     0   :  { %s2325_s0 = inlined_call_operand.vmem [shape: bf16[16,1024], index: 0, kind: input, shape index: {}]   ;;  %s2326_s1 = inlined_call_operand.vmem [shape: bf16[1024,32], index: 1, kind: input, shape index: {}]   ;;  %s2327_s2 = inlined_call_operand.vmem [shape: f32[1,32], index: 2, kind: input, shape index: {}]   ;;  %s2328_s3 = inlined_call_operand.vmem [shape: f32[32,8], index: 3, kind: input, shape index: {}]   ;;  %s2329_s4 = inlined_call_operand.vmem [shape: f32[1,8], index: 4, kind: input, shape index: {}]   ;;  %s2330_s5 = inlined_call_operand.vmem [shape: f32[16,8], index: 5, kind: output, shape index: {0}]   ;;  %s2331_s6 = inlined_call_operand.hbm [shape: f32[1,1], index: 6, kind: output, shape index: {1}]  }
   0x1   :  { %v1825_v0 = vld [vmem:[%s2326_s1 + $0x40] sm:$0xff]   ;;  %v1829_v4 = vld [vmem:[%s2326_s1 + $0x48] sm:$0xff]   ;;  %v1833_v8 = vld [vmem:[%s2326_s1 + $0x50] sm:$0xff]  }
   0x2   :  { %v1826_v1 = vld [vmem:[%s2326_s1 + $0xc0] sm:$0xff]   ;;  %1614 = vmatprep.subr.bf16.mxu0 %v1825_v0  ;;  %v1830_v5 = vld [vmem:[%s2326_s1 + $0xc8] sm:$0xff]   ;;  %v1834_v9 = vld [vmem:[%s2326_s1 + $0xd0] sm:$0xff]  }
   0x3   :  { %v1827_v2 = vld [vmem:[%s2326_s1] sm:$0xff]   ;;  %1636 = vmatprep.subr.bf16.mxu1 %v1826_v1  ;;  %v1831_v6 = vld [vmem:[%s2326_s1 + $0x8] sm:$0xff]   ;;  %v1835_v10 = vld [vmem:[%s2326_s1 + $0x10] sm:$0xff]  }
   0x4   :  { %v1828_v3 = vld [vmem:[%s2326_s1 + $0x80] sm:$0xff]   ;;  %1615 = vmatpush3.bf16.msra.mxu0 %v1827_v2  ;;  %v1832_v7 = vld [vmem:[%s2326_s1 + $0x88] sm:$0xff]   ;;  %v1836_v11 = vld [vmem:[%s2326_s1 + $0x90] sm:$0xff]  }
   0x5   :  { %1637 = vmatpush3.bf16.msra.mxu1 %v1828_v3  ;;  %1616 = vmatprep.subr.bf16.mxu0 %v1829_v4  ;;  %v1837_v12 = vld [vmem:[%s2326_s1 + $0x58] sm:$0xff]   ;;  %v1841_v16 = vld [vmem:[%s2326_s1 + $0x60] sm:$0xff]   ;;  %v1845_v20 = vld [vmem:[%s2326_s1 + $0x68] sm:$0xff]  }
   0x6   :  { %1638 = vmatprep.subr.bf16.mxu1 %v1830_v5  ;;  %v1838_v13 = vld [vmem:[%s2326_s1 + $0xd8] sm:$0xff]   ;;  %v1842_v17 = vld [vmem:[%s2326_s1 + $0xe0] sm:$0xff]   ;;  %v1846_v21 = vld [vmem:[%s2326_s1 + $0xe8] sm:$0xff]  }
   0x7   :  { %v1839_v14 = vld [vmem:[%s2326_s1 + $0x18] sm:$0xff]   ;;  %v1843_v18 = vld [vmem:[%s2326_s1 + $0x20] sm:$0xff]   ;;  %v1847_v22 = vld [vmem:[%s2326_s1 + $0x28] sm:$0xff]  }
   0x8   :  { %1617 = vmatpush3.bf16.msra.mxu0 %v1831_v6  ;;  %v1840_v15 = vld [vmem:[%s2326_s1 + $0x98] sm:$0xff]   ;;  %v1844_v19 = vld [vmem:[%s2326_s1 + $0xa0] sm:$0xff]   ;;  %v1848_v23 = vld [vmem:[%s2326_s1 + $0xa8] sm:$0xff]  }
   0x9   :  { %1639 = vmatpush3.bf16.msra.mxu1 %v1832_v7  ;;  %1618 = vmatprep.subr.bf16.mxu0 %v1833_v8  ;;  %v1849_v24 = vld [vmem:[%s2326_s1 + $0x70] sm:$0xff]   ;;  %v1853_v28 = vld [vmem:[%s2326_s1 + $0x78] sm:$0xff]   ;;  %v24_v32 = vld [vmem:[%s2325_s0] sm:$0xff] }
   0xa   :  { %1640 = vmatprep.subr.bf16.mxu1 %v1834_v9  ;;  %v1850_v25 = vld [vmem:[%s2326_s1 + $0xf0] sm:$0xff]   ;;  %v1854_v29 = vld [vmem:[%s2326_s1 + $0xf8] sm:$0xff]   ;;  %v28_v33 = vld [vmem:[%s2325_s0 + $0x20] sm:$0xff] }
   0xb   :  { %v1851_v26 = vld [vmem:[%s2326_s1 + $0x30] sm:$0xff]   ;;  %v1855_v30 = vld [vmem:[%s2326_s1 + $0x38] sm:$0xff]   ;;  %v25_v34 = vld [vmem:[%s2325_s0 + $0x8] sm:$0xff]  ;;  %v1522_v35 = vcombine.low %v24_v32, %v28_v33  ;;  %v1523_v36 = vcombine.high %v24_v32, %v28_v33 }
   0xc   :  { %1619 = vmatpush3.bf16.msra.mxu0 %v1835_v10  ;;  %v1852_v27 = vld [vmem:[%s2326_s1 + $0xb0] sm:$0xff]   ;;  %v1856_v31 = vld [vmem:[%s2326_s1 + $0xb8] sm:$0xff]   ;;  %v29_v37 = vld [vmem:[%s2325_s0 + $0x28] sm:$0xff] }
   0xd   :  { %1641 = vmatpush3.bf16.msra.mxu1 %v1836_v11  ;;  %1620 = vmatprep.subr.bf16.mxu0 %v1837_v12  ;;  %v1524_v38 = vcombine.low %v25_v34, %v29_v37  ;;  %v1525_v39 = vcombine.high %v25_v34, %v29_v37  ;;  %v1857_v40 = vld [vmem:[%s2326_s1 + $0x140] sm:$0xff]   ;;  %v1861_v44 = vld [vmem:[%s2326_s1 + $0x148] sm:$0xff]   ;;  %v1865_v48 = vld [vmem:[%s2326_s1 + $0x150] sm:$0xff]  }
   0xe   :  { %1642 = vmatprep.subr.bf16.mxu1 %v1838_v13  ;;  %623 = vmatprep.mubr.bf16.mxu0 %v1523_v36  ;;  %v1858_v41 = vld [vmem:[%s2326_s1 + $0x1c0] sm:$0xff]   ;;  %v1862_v45 = vld [vmem:[%s2326_s1 + $0x1c8] sm:$0xff]   ;;  %v1866_v49 = vld [vmem:[%s2326_s1 + $0x1d0] sm:$0xff]  }
   0xf   :  { %664 = vmatprep.mubr.bf16.mxu1 %v1525_v39  ;;  %v1859_v42 = vld [vmem:[%s2326_s1 + $0x100] sm:$0xff]   ;;  %v1863_v46 = vld [vmem:[%s2326_s1 + $0x108] sm:$0xff]   ;;  %v1867_v50 = vld [vmem:[%s2326_s1 + $0x110] sm:$0xff]  }
  0x10   :  { %1621 = vmatpush3.bf16.msra.mxu0 %v1839_v14  ;;  %v1860_v43 = vld [vmem:[%s2326_s1 + $0x180] sm:$0xff]   ;;  %v1864_v47 = vld [vmem:[%s2326_s1 + $0x188] sm:$0xff]   ;;  %v1868_v51 = vld [vmem:[%s2326_s1 + $0x190] sm:$0xff]  }
  0x11   :  { %1643 = vmatpush3.bf16.msra.mxu1 %v1840_v15  ;;  %1622 = vmatprep.subr.bf16.mxu0 %v1841_v16  ;;  %v1869_v52 = vld [vmem:[%s2326_s1 + $0x158] sm:$0xff]   ;;  %v1873_v56 = vld [vmem:[%s2326_s1 + $0x160] sm:$0xff]   ;;  %v1877_v60 = vld [vmem:[%s2326_s1 + $0x168] sm:$0xff]  }
  0x12   :  { %1644 = vmatprep.subr.bf16.mxu1 %v1842_v17  ;;  %v1870_v53 = vld [vmem:[%s2326_s1 + $0x1d8] sm:$0xff]   ;;  %v1874_v57 = vld [vmem:[%s2326_s1 + $0x1e0] sm:$0xff]   ;;  %v1878_v61 = vld [vmem:[%s2326_s1 + $0x1e8] sm:$0xff]  }
  0x13   :  { %v1871_v54 = vld [vmem:[%s2326_s1 + $0x118] sm:$0xff]   ;;  %v1875_v58 = vld [vmem:[%s2326_s1 + $0x120] sm:$0xff]   ;;  %v1879_v62 = vld [vmem:[%s2326_s1 + $0x128] sm:$0xff]  }
  0x14   :  { %1623 = vmatpush3.bf16.msra.mxu0 %v1843_v18  ;;  %v1872_v55 = vld [vmem:[%s2326_s1 + $0x198] sm:$0xff]   ;;  %v1876_v59 = vld [vmem:[%s2326_s1 + $0x1a0] sm:$0xff]   ;;  %v1880_v63 = vld [vmem:[%s2326_s1 + $0x1a8] sm:$0xff]  }
  0x15   :  { %1645 = vmatpush3.bf16.msra.mxu1 %v1844_v19  ;;  %1624 = vmatprep.subr.bf16.mxu0 %v1845_v20  ;;  %v1881_v0 = vld [vmem:[%s2326_s1 + $0x170] sm:$0xff]   ;;  %v1885_v4 = vld [vmem:[%s2326_s1 + $0x178] sm:$0xff]  }
  0x16   :  { %1646 = vmatprep.subr.bf16.mxu1 %v1846_v21  ;;  %v1882_v1 = vld [vmem:[%s2326_s1 + $0x1f0] sm:$0xff]   ;;  %v1886_v5 = vld [vmem:[%s2326_s1 + $0x1f8] sm:$0xff]  }
  0x17   :  { %v1883_v2 = vld [vmem:[%s2326_s1 + $0x130] sm:$0xff]   ;;  %v1887_v6 = vld [vmem:[%s2326_s1 + $0x138] sm:$0xff]  }
  0x18   :  { %1625 = vmatpush3.bf16.msra.mxu0 %v1847_v22  ;;  %v1884_v3 = vld [vmem:[%s2326_s1 + $0x1b0] sm:$0xff]   ;;  %v1888_v7 = vld [vmem:[%s2326_s1 + $0x1b8] sm:$0xff]  }
  0x19   :  { %1647 = vmatpush3.bf16.msra.mxu1 %v1848_v23  ;;  %1626 = vmatprep.subr.bf16.mxu0 %v1849_v24  ;;  %v26_v8 = vld [vmem:[%s2325_s0 + $0x10] sm:$0xff]  ;;  %v27_v12 = vld [vmem:[%s2325_s0 + $0x18] sm:$0xff] }
  0x1a   :  { %1648 = vmatprep.subr.bf16.mxu1 %v1850_v25  ;;  %v30_v9 = vld [vmem:[%s2325_s0 + $0x30] sm:$0xff]  ;;  %v31_v13 = vld [vmem:[%s2325_s0 + $0x38] sm:$0xff] }
  0x1b   :  { %v1526_v10 = vcombine.low %v26_v8, %v30_v9  ;;  %v1527_v11 = vcombine.high %v26_v8, %v30_v9 }
  0x1c   :  { %1627 = vmatpush3.bf16.msra.mxu0 %v1851_v26 }
  0x1d   :  { %1649 = vmatpush3.bf16.msra.mxu1 %v1852_v27  ;;  %1628 = vmatprep.subr.bf16.mxu0 %v1853_v28 }
  0x1e   :  { %1650 = vmatprep.subr.bf16.mxu1 %v1854_v29 }
  0x20   :  { %1629 = vmatpush3.bf16.msra.mxu0 %v1855_v30 }
  0x21   :  { %1651 = vmatpush3.bf16.msra.mxu1 %v1856_v31  ;;  %1658 = vmatprep.subr.bf16.mxu0 %v1857_v40 }
  0x22   :  { %1680 = vmatprep.subr.bf16.mxu1 %v1858_v41 }
  0x23   :  { %624 = vmatmul.mubr.bf16.vlgmr.msra.gmra.mrb[0].mxu0 %v1522_v35 }
  0x24   :  { %665 = vmatmul.mubr.bf16.vlgmr.msra.gmra.mrb[0].mxu1 %v1524_v38  ;;  %1659 = vmatpush3.bf16.msra.mxu0 %v1859_v42 }
  0x25   :  { %1681 = vmatpush3.bf16.msra.mxu1 %v1860_v43  ;;  %1660 = vmatprep.subr.bf16.mxu0 %v1861_v44 }
  0x26   :  { %1682 = vmatprep.subr.bf16.mxu1 %v1862_v45 }
  0x28   :  { %1661 = vmatpush3.bf16.msra.mxu0 %v1863_v46 }
  0x29   :  { %1683 = vmatpush3.bf16.msra.mxu1 %v1864_v47  ;;  %1662 = vmatprep.subr.bf16.mxu0 %v1865_v48 }
  0x2a   :  { %1684 = vmatprep.subr.bf16.mxu1 %v1866_v49 }
  0x2c   :  { %1663 = vmatpush3.bf16.msra.mxu0 %v1867_v50 }
  0x2d   :  { %1685 = vmatpush3.bf16.msra.mxu1 %v1868_v51  ;;  %1664 = vmatprep.subr.bf16.mxu0 %v1869_v52 }
  0x2e   :  { %1686 = vmatprep.subr.bf16.mxu1 %v1870_v53 }
  0x30   :  { %1665 = vmatpush3.bf16.msra.mxu0 %v1871_v54 }
  0x31   :  { %1687 = vmatpush3.bf16.msra.mxu1 %v1872_v55  ;;  %1666 = vmatprep.subr.bf16.mxu0 %v1873_v56 }
  0x32   :  { %1688 = vmatprep.subr.bf16.mxu1 %v1874_v57 }
  0x34   :  { %1667 = vmatpush3.bf16.msra.mxu0 %v1875_v58 }
  0x35   :  { %1689 = vmatpush3.bf16.msra.mxu1 %v1876_v59  ;;  %1668 = vmatprep.subr.bf16.mxu0 %v1877_v60 }
  0x36   :  { %1690 = vmatprep.subr.bf16.mxu1 %v1878_v61 }
  0x38   :  { %1669 = vmatpush3.bf16.msra.mxu0 %v1879_v62 }
  0x39   :  { %1691 = vmatpush3.bf16.msra.mxu1 %v1880_v63  ;;  %1670 = vmatprep.subr.bf16.mxu0 %v1881_v0 }
  0x3a   :  { %1692 = vmatprep.subr.bf16.mxu1 %v1882_v1 }
  0x3c   :  { %1671 = vmatpush3.bf16.msra.mxu0 %v1883_v2 }
  0x3d   :  { %1693 = vmatpush3.bf16.msra.mxu1 %v1884_v3  ;;  %1672 = vmatprep.subr.bf16.mxu0 %v1885_v4 }
  0x3e   :  { %1694 = vmatprep.subr.bf16.mxu1 %v1886_v5 }
  0x40   :  { %1673 = vmatpush3.bf16.msra.mxu0 %v1887_v6 }
  0x41   :  { %12 = vsyncpa [#allocation3], 0  ;;  %1695 = vmatpush3.bf16.msra.mxu1 %v1888_v7  ;;  %v1528_v14 = vcombine.low %v27_v12, %v31_v13  ;;  %v1529_v15 = vcombine.high %v27_v12, %v31_v13  ;;  %705 = vmatprep.mubr.bf16.mxu0 %v1527_v11  ;;  %v755_v16 = vld [vmem:[%s2328_s3] sm:$0xff]  ;;  %v756_v17 = vld [vmem:[%s2328_s3 + $0x8] sm:$0xff]  ;;  %vm766_vm0 = vcmask 261120   ;;  %vm857_vm1 = vcmask 64512  }
  0x42   :  { %v1785_v18 = vpack.c.bf16 %v756_v17, %v755_v16  ;;  %v757_v19 = vld [vmem:[%s2328_s3 + $0x10] sm:$0xff]  ;;  %v758_v20 = vld [vmem:[%s2328_s3 + $0x18] sm:$0xff]  ;;  %v1521_v24 = vld [vmem:[%s2327_s2] ss:$0 sm:$0xff]  ;;  %vm984_vm3 = vcmask 130048   ;;  %vm924_vm4 = vcmask 57344  }
  0x43   :  { %746 = vmatprep.mubr.bf16.mxu1 %v1529_v15  ;;  %706 = vmatmul.mubr.bf16.vlgmr.msra.gmra.mrb[4].mxu0 %v1526_v10  ;;  %v1789_v21 = vpack.c.bf16 %v758_v20, %v757_v19  ;;  %v1594_v63 = vld [vmem:[%s2329_s4] ss:$0 sm:$0xff]  ;;  %s1915_s19 = scalar_lea.hbm %s2331_s6, 16 }
  0x44   :  { %747 = vmatmul.mubr.bf16.vlgmr.msra.gmra.mrb[4].mxu1 %v1528_v14  ;;  %1786 = vmatprep.subr.bf16.mxu0 %v1785_v18  ;;  %p1916_p0 = scmp.ne.s32.totalorder %s2331_s6, %s1915_s19  ;;  %p1919_p1 = scmp.lt.u32.totalorder %s1915_s19, %s2331_s6 }
  0x45   :  { %1788 = vmatpush3.bf16.msra.mxu0 %v1785_v18 }
  0x46   :  { %1790 = vmatprep.subr.bf16.mxu0 %v1789_v21  ;;  %p1921_p2 = pnand %p1919_p1, %p1916_p0 }
  0x49   :  { %1792 = vmatpush3.bf16.msra.mxu0 %v1789_v21  ;;  %v848_v21 = vlaneseq }
  0xf6   :  { %v1630_v22 = vpop.f32.mrb[0].mxu0 }
  0xf7   :  { %v1652_v23 = vpop.f32.mrb[0].mxu1  ;;  %v1631_v25 = vpop.f32.mrb[1].mxu0 }
  0xf8   :  { %v1632_v26 = vadd.f32 %v1631_v25, %v1630_v22  ;;  %v1653_v27 = vpop.f32.mrb[1].mxu1  ;;  %v1633_v28 = vpop.f32.mrb[2].mxu0 }
  0xf9   :  { %v1654_v29 = vadd.f32 %v1653_v27, %v1652_v23  ;;  %v1655_v30 = vpop.f32.mrb[2].mxu1  ;;  %v1634_v31 = vpop.f32.mrb[3].mxu0  ;;  %v849_v23 = vshrl.u32 %v848_v21, 7 }
  0xfa   :  { %v626_v32 = vadd.f32 %v1632_v26, %v1521_v24  ;;  %v1635_v33 = vadd.f32 %v1634_v31, %v1633_v28  ;;  %v1656_v34 = vpop.f32.mrb[3].mxu1  ;;  %v1927_v26 = vmov 0.0  }
  0xfb   :  { %v1657_v35 = vadd.f32 %v1656_v34, %v1655_v30  ;;  %vm851_vm2 = vcmp.lt.s32.totalorder %v849_v23, 2 }
  0xfc   :  { %v667_v36 = vadd.f32 %v1654_v29, %v626_v32  ;;  %v629_v37 = vadd.f32 %v1635_v33, %v1521_v24  ;;  %v2236_v27 = vsel %vm851_vm2, 1.0, %v1927_v26 }
  0xfe   :  { %v670_v38 = vadd.f32 %v1657_v35, %v629_v37 }
 0x116   :  { %v1674_v39 = vpop.f32.mrb[4].mxu0 }
 0x117   :  { %v1696_v40 = vpop.f32.mrb[4].mxu1  ;;  %v1675_v41 = vpop.f32.mrb[5].mxu0 }
 0x118   :  { %v1676_v42 = vadd.f32 %v1675_v41, %v1674_v39  ;;  %v1697_v43 = vpop.f32.mrb[5].mxu1  ;;  %v1677_v44 = vpop.f32.mrb[6].mxu0 }
 0x119   :  { %v1698_v45 = vadd.f32 %v1697_v43, %v1696_v40  ;;  %v1699_v46 = vpop.f32.mrb[6].mxu1  ;;  %v1678_v47 = vpop.f32.mrb[7].mxu0 }
 0x11a   :  { %v708_v48 = vadd.f32 %v1676_v42, %v667_v36  ;;  %v1679_v49 = vadd.f32 %v1678_v47, %v1677_v44  ;;  %v1700_v50 = vpop.f32.mrb[7].mxu1 }
 0x11b   :  { %v1701_v51 = vadd.f32 %v1700_v50, %v1699_v46 }
 0x11c   :  { %v749_v52 = vadd.f32 %v1698_v45, %v708_v48  ;;  %v711_v53 = vadd.f32 %v1679_v49, %v670_v38 }
 0x11e   :  { %v752_v54 = vadd.f32 %v1701_v51, %v711_v53  ;;  %1740 = vmatprep.mubr.msk.f32.mxu0 %vm766_vm0, %v749_v52  ;;  %v936_v55 = vmul.f32 %v749_v52, %v749_v52 }
 0x120   :  { %1741 = vmatmul.mubr.msk.f32.vlgmr.msra.gmra.mrb[8].mxu0 %vm766_vm0, %v752_v54  ;;  %v938_v56 = vsel %vm766_vm0, %v936_v55, 0.0  ;;  %v937_v57 = vmul.f32 %v752_v54, %v752_v54 }
 0x121   :  { %939 = vadd.xlane.f32.xlu1 %v938_v56 }
 0x122   :  { %v941_v58 = vsel %vm766_vm0, %v937_v57, 0.0 }
 0x125   :  { %942 = vadd.xlane.f32.xlu1 %v941_v58 }
 0x1ae   :  { %v940_v59 = vpop.xlane.xlu1 %939 }
 0x1af   :  { %v944_v60 = vadd.f32 1e-30, %v940_v59 }
 0x1b1   :  { %1889 = vrsqrt.f32 %v944_v60 }
 0x1b2   :  { %v943_v16 = vpop.xlane.xlu1 %942 }
 0x1b3   :  { %v945_v17 = vadd.f32 1e-30, %v943_v16 }
 0x1bb   :  { %v1890_v61 = vpop.eup %1889 }
 0x1bc   :  { %v2199_v62 = vmul.f32 %v1890_v61, %v749_v52 }
 0x1be   :  { %1761 = vmatprep.mubr.msk.f32.mxu0 %vm766_vm0, %v2199_v62 }
 0x1f3   :  { %v1742_v0 = vpop.f32.mrb[8].mxu0 }
 0x1f4   :  { %v845_v1 = vadd.f32 %v1742_v0, %v1594_v63  ;;  %v839_v2 = vpop.f32.mrb[9].mxu0 }
 0x1f5   :  { %v840_v3 = vadd.f32 %v1594_v63, %v839_v2 }
 0x1f6   :  { %1501 = vst.msk [vmem:[%s2330_s5 + $0x8] sm:$0xff] %vm857_vm1, %v845_v1  ;;  %v861_v5 = vsel %vm857_vm1, %v845_v1, -inf }
 0x1f7   :  { %1500 = vst.msk [vmem:[%s2330_s5] sm:$0xff] %vm857_vm1, %v840_v3  ;;  %v858_v4 = vsel %vm857_vm1, %v840_v3, -inf }
 0x1f8   :  { %859 = vmax.xlane.f32.xlu0 %v858_v4 }
 0x1fc   :  { %862 = vmax.xlane.f32.xlu0 %v861_v5 }
 0x285   :  { %v860_v6 = vpop.xlane.xlu0 %859 }
 0x286   :  { %v2216_v7 = vsub.f32 %v840_v3, %v860_v6 }
 0x288   :  { %v866_v8 = vmul.f32 1.442695, %v2216_v7 }
 0x289   :  { %v863_v9 = vpop.xlane.xlu0 %862 }
 0x28a   :  { %1891 = vpow2.f32 %v866_v8  ;;  %v2219_v10 = vsub.f32 %v845_v1, %v863_v9 }
 0x28c   :  { %v868_v11 = vmul.f32 1.442695, %v2219_v10 }
 0x28e   :  { %1893 = vpow2.f32 %v868_v11 }
 0x28f   :  { %1895 = vrsqrt.f32 %v945_v17 }
 0x294   :  { %v1892_v12 = vpop.eup %1891 }
 0x295   :  { %v870_v13 = vsel %vm857_vm1, %v1892_v12, 0.0 }
 0x296   :  { %871 = vadd.xlane.f32.xlu0 %v870_v13 }
 0x298   :  { %v1894_v14 = vpop.eup %1893 }
 0x299   :  { %v873_v15 = vsel %vm857_vm1, %v1894_v14, 0.0  ;;  %v1896_v18 = vpop.eup %1895 }
 0x29a   :  { %874 = vadd.xlane.f32.xlu1 %v873_v15  ;;  %v2225_v19 = vmul.f32 %v1896_v18, %v752_v54 }
 0x2c3   :  { %952 = vxpose.xlu0.b32.start [1/2] (short) (narrow) %v2199_v62, 32 }
 0x2c7   :  { %953 = vxpose.xlu0.b32.end [2/2] (short) (narrow) %v2225_v19, 32 }
 0x323   :  { %v2228_v20 = vpop.xlane.xlu0 %871 }
 0x324   :  { %1897 = vrcp.f32 %v2228_v20 }
 0x327   :  { %v2231_v22 = vpop.xlane.xlu1 %874 }
 0x328   :  { %1899 = vrcp.f32 %v2231_v22 }
 0x32e   :  { %v1898_v24 = vpop.eup %1897 }
 0x32f   :  { %v877_v25 = vmul.f32 %v1898_v24, %v1892_v12 }
 0x331   :  { %v898_v28 = vadd.f32 1e-05, %v877_v25  ;;  %v886_v31 = vmul.f32 %v2236_v27, %v877_v25 }
 0x332   :  { %v1900_v29 = vpop.eup %1899 }
 0x333   :  { %v879_v30 = vmul.f32 %v1900_v29, %v1894_v14  ;;  %1901 = vlog2.f32 %v898_v28  ;;  %v888_v34 = vsel %vm857_vm1, %v886_v31, 0.0 }
 0x335   :  { %v887_v32 = vmul.f32 0.0, %v879_v30  ;;  %v899_v33 = vadd.f32 1e-05, %v879_v30 }
 0x337   :  { %v889_v35 = vsel %vm857_vm1, %v887_v32, 0.0  ;;  %v1793_v36 = vpack.c.bf16 %v887_v32, %v886_v31  ;;  %1903 = vlog2.f32 %v899_v33 }
 0x338   :  { %v890_v37 = vadd.f32 %v889_v35, %v888_v34 }
 0x339   :  { %1794 = vmatprep.subr.bf16.mxu1 %v1793_v36 }
 0x33a   :  { %1796 = vmatpush3.bf16.msra.mxu1 %v1793_v36  ;;  %v891_v38 = vrot.slane %v890_v37, 4 }
 0x33c   :  { %v892_v39 = vadd.f32 %v891_v38, %v890_v37 }
 0x33d   :  { %v1902_v40 = vpop.eup %1901 }
 0x33e   :  { %v893_v41 = vrot.slane %v892_v39, 2  ;;  %v901_v42 = vmul.f32 0.6931472, %v1902_v40 }
 0x340   :  { %v894_v43 = vadd.f32 %v893_v41, %v892_v39  ;;  %v904_v44 = vmul.f32 %v901_v42, %v886_v31 }
 0x341   :  { %v1904_v45 = vpop.eup %1903 }
 0x342   :  { %v895_v46 = vrot.slane %v894_v43, 1  ;;  %v903_v47 = vmul.f32 0.6931472, %v1904_v45  ;;  %v906_v52 = vsel %vm857_vm1, %v904_v44, 0.0 }
 0x343   :  { %v968_v48 = vpop.trf.xlu0 }
 0x344   :  { %1747 = vmatprep.mubr.msk.f32.mxu1 %vm984_vm3, %v968_v48  ;;  %v896_v49 = vadd.f32 %v895_v46, %v894_v43  ;;  %v905_v50 = vmul.f32 %v903_v47, %v887_v32 }
 0x346   :  { %v897_v51 = vmul.f32 0.5, %v896_v49  ;;  %v907_v53 = vsel %vm857_vm1, %v905_v50, 0.0  ;;  %v1082_v0 = vadd.f32 1e-08, %v896_v49 }
 0x347   :  { %v2244_v54 = vpop.trf.xlu0  ;;  %v2246_v55 = vadd.f32 %v907_v53, %v906_v52 }
 0x348   :  { %1748 = vmatmul.mubr.msk.f32.vlgmr.msra.gmra.mrb[8].mxu1 %vm984_vm3, %v2244_v54  ;;  %v920_v56 = vadd.f32 1e-05, %v897_v51 }
 0x34a   :  { %1905 = vlog2.f32 %v920_v56 }
 0x34b   :  { %v2250_v57 = vpop.trf.xlu0  ;;  %1907 = vrcp.f32 %v1082_v0 }
 0x34c   :  { %1750 = vmatprep.mubr.msk.f32.mxu1 %vm984_vm3, %v2250_v57 }
 0x34f   :  { %v2254_v58 = vpop.trf.xlu0 }
 0x350   :  { %1751 = vmatmul.mubr.msk.f32.gmra.mrb[10].mxu1 %vm984_vm3, %v2254_v58 }
 0x351   :  { %1768 = vmatprep.mubr.msk.f32.mxu1 %vm984_vm3, %v968_v48 }
 0x354   :  { %v1906_v59 = vpop.eup %1905 }
 0x355   :  { %v922_v60 = vmul.f32 0.6931472, %v1906_v59  ;;  %v1908_v1 = vpop.eup %1907 }
 0x357   :  { %v923_v61 = vmul.f32 %v922_v60, %v897_v51 }
 0x359   :  { %v925_v63 = vsel %vm924_vm4, %v923_v61, 0.0 }
 0x35a   :  { %926 = vadd.xlane.f32.xlu0 %v925_v63 }
 0x41b   :  { %v1749_v2 = vpop.f32.mrb[8].mxu1 }
 0x41c   :  { %v1085_v3 = vmul.f32 %v1908_v1, %v1749_v2  ;;  %v1063_v4 = vpop.f32.mrb[9].mxu1 }
 0x41d   :  { %v1084_v5 = vmul.f32 %v1908_v1, %v1063_v4 }
 0x41e   :  { %v1089_v6 = vmul.f32 %v1085_v3, %v1085_v3 }
 0x41f   :  { %v1088_v8 = vmul.f32 %v1084_v5, %v1084_v5  ;;  %v1797_v9 = vpack.c.bf16 %v1085_v3, %v1084_v5 }
 0x420   :  { %v1093_v11 = vsel %vm857_vm1, %v1089_v6, 0.0 }
 0x421   :  { %v1092_v12 = vsel %vm857_vm1, %v1088_v8, 0.0  ;;  %1798 = vmatprep.subr.bf16.mxu0 %v1797_v9 }
 0x422   :  { %v1094_v13 = vadd.f32 %v1093_v11, %v1092_v12  ;;  %1800 = vmatpush3.bf16.msra.mxu0 %v1797_v9 }
 0x423   :  { %v1752_v14 = vpop.f32.mrb[10].mxu1 }
 0x424   :  { %v1087_v15 = vmul.f32 %v1908_v1, %v1752_v14  ;;  %v1073_v16 = vpop.f32.mrb[11].mxu1 }
 0x425   :  { %v1086_v17 = vmul.f32 %v1908_v1, %v1073_v16 }
 0x426   :  { %v1091_v18 = vmul.f32 %v1087_v15, %v1087_v15 }
 0x427   :  { %v1090_v23 = vmul.f32 %v1086_v17, %v1086_v17  ;;  %v1801_v24 = vpack.c.bf16 %v1087_v15, %v1086_v17 }
 0x428   :  { %v1097_v29 = vsel %vm857_vm1, %v1091_v18, 0.0 }
 0x429   :  { %v1095_v25 = vsel %vm857_vm1, %v1090_v23, 0.0  ;;  %1802 = vmatprep.subr.bf16.mxu0 %v1801_v24 }
 0x42a   :  { %v1096_v28 = vadd.f32 %v1095_v25, %v1094_v13  ;;  %1804 = vmatpush3.bf16.msra.mxu0 %v1801_v24 }
 0x42c   :  { %v1098_v30 = vadd.f32 %v1097_v29, %v1096_v28 }
 0x42d   :  { %1762 = vmatmul.mubr.msk.f32.vlgmr.msra.gmra.mrb[10].mxu0 %vm766_vm0, %v2225_v19 }
 0x42e   :  { %1782 = vmatprep.mubr.msk.f32.mxu0 %vm766_vm0, %v2199_v62  ;;  %v1099_v31 = vrot.slane %v1098_v30, 4  ;;  %v2270_v62 = vand.u32 127, %v848_v21 }
 0x430   :  { %v1100_v32 = vadd.f32 %v1099_v31, %v1098_v30 }
 0x432   :  { %v1101_v33 = vrot.slane %v1100_v32, 2 }
 0x434   :  { %v1102_v34 = vadd.f32 %v1101_v33, %v1100_v32 }
 0x436   :  { %v1103_v35 = vrot.slane %v1102_v34, 1 }
 0x438   :  { %v1104_v39 = vadd.f32 %v1103_v35, %v1102_v34 }
 0x500   :  { %v1763_v36 = vpop.f32.mrb[10].mxu0 }
 0x501   :  { %v1187_v37 = vmul.f32 2.0, %v1763_v36  ;;  %v1177_v38 = vpop.f32.mrb[11].mxu0 }
 0x502   :  { %v1186_v40 = vmul.f32 2.0, %v1177_v38 }
 0x503   :  { %v1189_v41 = vsub.f32 %v1104_v39, %v1187_v37 }
 0x504   :  { %v1188_v42 = vsub.f32 %v1104_v39, %v1186_v40 }
 0x505   :  { %v1193_v44 = vsel %vm857_vm1, %v1189_v41, inf }
 0x506   :  { %v1190_v43 = vsel %vm857_vm1, %v1188_v42, inf }
 0x507   :  { %1191 = vmin.xlane.f32.xlu1 %v1190_v43 }
 0x50b   :  { %1194 = vmin.xlane.f32.xlu1 %v1193_v44 }
 0x594   :  { %v1192_v45 = vpop.xlane.xlu1 %1191 }
 0x595   :  { %vm1196_vm5 = vcmp.le.f32.partialorder %v1188_v42, %v1192_v45 }
 0x596   :  { %v1198_v46 = vsel %vm1196_vm5, %v2270_v62, 8 }
 0x597   :  { %v1200_v47 = vsel %vm857_vm1, %v1198_v46, 2147483647 }
 0x598   :  { %v1195_v48 = vpop.xlane.xlu1 %1194  ;;  %v1202_v49 = vshra.s32 %v1200_v47, 16  ;;  %v1201_v21 = vand.u32 65535, %v1200_v47 }
 0x599   :  { %vm1197_vm6 = vcmp.le.f32.partialorder %v1189_v41, %v1195_v48 }
 0x59a   :  { %v1199_v50 = vsel %vm1197_vm6, %v2270_v62, 8  ;;  %v1204_v51 = vcvt.s32.f32 %v1202_v49  ;;  %v1203_v60 = vcvt.s32.f32 %v1201_v21 }
 0x59b   :  { %v1215_v52 = vsel %vm857_vm1, %v1199_v50, 2147483647 }
 0x59c   :  { %1205 = vmin.xlane.f32.xlu1 %v1204_v51  ;;  %v1217_v53 = vshra.s32 %v1215_v52, 16  ;;  %v1216_v61 = vand.u32 65535, %v1215_v52 }
 0x59e   :  { %v1219_v56 = vcvt.s32.f32 %v1217_v53  ;;  %v1218_v1 = vcvt.s32.f32 %v1216_v61 }
 0x5a0   :  { %1220 = vmin.xlane.f32.xlu1 %v1219_v56 }
 0x629   :  { %v1206_v59 = vpop.xlane.xlu1 %1205 }
 0x62a   :  { %vm1207_vm7 = vcmp.eq.f32.partialorder %v1204_v51, %v1206_v59  ;;  %v1212_v3 = vcvt.f32.s32 %v1206_v59 }
 0x62b   :  { %v1208_v63 = vsel %vm1207_vm7, %v1203_v60, inf }
 0x62c   :  { %1209 = vmin.xlane.f32.xlu1 %v1208_v63  ;;  %v1213_v5 = vshll.u32 %v1212_v3, 16 }
 0x62d   :  { %v1221_v0 = vpop.xlane.xlu1 %1220 }
 0x62e   :  { %vm1222_vm8 = vcmp.eq.f32.partialorder %v1219_v56, %v1221_v0  ;;  %v1227_v6 = vcvt.f32.s32 %v1221_v0 }
 0x62f   :  { %v1223_v2 = vsel %vm1222_vm8, %v1218_v1, inf }
 0x630   :  { %1224 = vmin.xlane.f32.xlu1 %v1223_v2  ;;  %v1228_v12 = vshll.u32 %v1227_v6, 16 }
 0x6b9   :  { %v1210_v4 = vpop.xlane.xlu1 %1209 }
 0x6ba   :  { %v1211_v8 = vcvt.f32.s32 %v1210_v4 }
 0x6bc   :  { %v1214_v9 = vadd.s32 %v1213_v5, %v1211_v8 }
 0x6bd   :  { %v1225_v11 = vpop.xlane.xlu1 %1224 }
 0x6be   :  { %vm1230_vm9 = vcmp.eq.s32.totalorder %v2270_v62, %v1214_v9  ;;  %v1226_v13 = vcvt.f32.s32 %v1225_v11 }
 0x6bf   :  { %v1604_v14 = vsel %vm1230_vm9, 1.0, %v1927_v26 }
 0x6c0   :  { %v1229_v15 = vadd.s32 %v1228_v12, %v1226_v13  ;;  %v1236_v16 = vmul.f32 %v1604_v14, %v2236_v27 }
 0x6c2   :  { %vm1231_vm10 = vcmp.eq.s32.totalorder %v2270_v62, %v1229_v15  ;;  %v1323_v25 = vsel %vm857_vm1, %v1236_v16, 0.0 }
 0x6c3   :  { %v1605_v17 = vsel %vm1231_vm10, 1.0, %v1927_v26 }
 0x6c4   :  { %v1237_v18 = vmul.f32 0.0, %v1605_v17 }
 0x6c6   :  { %v1324_v23 = vsel %vm857_vm1, %v1237_v18, 0.0  ;;  %v1805_v24 = vpack.c.bf16 %v1237_v18, %v1236_v16 }
 0x6c7   :  { %v1325_v28 = vadd.f32 %v1324_v23, %v1323_v25 }
 0x6c8   :  { %1806 = vmatprep.subr.bf16.mxu1 %v1805_v24 }
 0x6c9   :  { %1808 = vmatpush3.bf16.msra.mxu1 %v1805_v24  ;;  %v1326_v29 = vrot.slane %v1325_v28, 4 }
 0x6cb   :  { %v1327_v30 = vadd.f32 %v1326_v29, %v1325_v28 }
 0x6cc   :  { %1769 = vmatmul.mubr.msk.f32.vlgmr.msra.gmra.mrb[12].mxu1 %vm984_vm3, %v2244_v54 }
 0x6cd   :  { %1771 = vmatprep.mubr.msk.f32.mxu1 %vm984_vm3, %v2250_v57  ;;  %v1328_v31 = vrot.slane %v1327_v30, 2 }
 0x6cf   :  { %v1329_v32 = vadd.f32 %v1328_v31, %v1327_v30 }
 0x6d0   :  { %1772 = vmatmul.mubr.msk.f32.gmra.mrb[14].mxu1 %vm984_vm3, %v2254_v58 }
 0x6d1   :  { %v1330_v33 = vrot.slane %v1329_v32, 1 }
 0x6d3   :  { %v1331_v34 = vadd.f32 %v1330_v33, %v1329_v32 }
 0x6d5   :  { %v1332_v35 = vadd.f32 1e-08, %v1331_v34  ;;  %v927_v34 = vpop.xlane.xlu0 %926 }
 0x6d7   :  { %1909 = vrcp.f32 %v1332_v35 }
 0x6d8   :  { %1911 = vlog2.f32 %v2228_v20 }
 0x6d9   :  { %1913 = vlog2.f32 %v2231_v22 }
 0x6e1   :  { %v1910_v36 = vpop.eup %1909 }
 0x79f   :  { %v1770_v37 = vpop.f32.mrb[12].mxu1 }
 0x7a0   :  { %v1335_v38 = vmul.f32 %v1910_v36, %v1770_v37  ;;  %v1304_v39 = vpop.f32.mrb[13].mxu1  ;;  %v928_v37 = vrot.slane %v927_v34, 4 }
 0x7a1   :  { %v1334_v40 = vmul.f32 %v1910_v36, %v1304_v39 }
 0x7a2   :  { %v1339_v54 = vmul.f32 %v1335_v38, %v1335_v38 }
 0x7a3   :  { %v1338_v41 = vmul.f32 %v1334_v40, %v1334_v40  ;;  %v1809_v42 = vpack.c.bf16 %v1335_v38, %v1334_v40  ;;  %v1773_v57 = vpop.f32.mrb[14].mxu1 }
 0x7a4   :  { %v1343_v43 = vsel %vm857_vm1, %v1339_v54, 0.0  ;;  %v1337_v58 = vmul.f32 %v1910_v36, %v1773_v57  ;;  %v1314_v44 = vpop.f32.mrb[15].mxu1 }
 0x7a5   :  { %v1342_v45 = vsel %vm857_vm1, %v1338_v41, 0.0  ;;  %v1336_v46 = vmul.f32 %v1910_v36, %v1314_v44  ;;  %1810 = vmatprep.subr.bf16.mxu0 %v1809_v42  ;;  %v1912_v36 = vpop.eup %1911 }
 0x7a6   :  { %v1344_v47 = vadd.f32 %v1343_v43, %v1342_v45  ;;  %1812 = vmatpush3.bf16.msra.mxu0 %v1809_v42  ;;  %v1341_v48 = vmul.f32 %v1337_v58, %v1337_v58  ;;  %v881_v41 = vmul.f32 0.6931472, %v1912_v36  ;;  %v1914_v57 = vpop.eup %1913  ;;  %v929_v43 = vadd.f32 %v928_v37, %v927_v34 }
 0x7a7   :  { %v1340_v49 = vmul.f32 %v1336_v46, %v1336_v46  ;;  %v1813_v50 = vpack.c.bf16 %v1337_v58, %v1336_v46  ;;  %v883_v22 = vmul.f32 0.6931472, %v1914_v57 }
 0x7a8   :  { %v1347_v53 = vsel %vm857_vm1, %v1341_v48, 0.0  ;;  %v884_v46 = vsub.f32 %v2216_v7, %v881_v41  ;;  %v930_v48 = vrot.slane %v929_v43, 2 }
 0x7a9   :  { %v1345_v51 = vsel %vm857_vm1, %v1340_v49, 0.0  ;;  %1814 = vmatprep.subr.bf16.mxu0 %v1813_v50 }
 0x7aa   :  { %v1346_v52 = vadd.f32 %v1345_v51, %v1344_v47  ;;  %1816 = vmatpush3.bf16.msra.mxu0 %v1813_v50 }
 0x7ac   :  { %v1348_v56 = vadd.f32 %v1347_v53, %v1346_v52 }
 0x7ad   :  { %1783 = vmatmul.mubr.msk.f32.vlgmr.msra.gmra.mrb[12].mxu0 %vm766_vm0, %v2225_v19 }
 0x7ae   :  { %v1349_v21 = vrot.slane %v1348_v56, 4 }
 0x7b0   :  { %v1350_v59 = vadd.f32 %v1349_v21, %v1348_v56  ;;  %v885_v21 = vsub.f32 %v2219_v10, %v883_v22 }
 0x7b2   :  { %v1351_v60 = vrot.slane %v1350_v59, 2 }
 0x7b4   :  { %v1352_v61 = vadd.f32 %v1351_v60, %v1350_v59  ;;  %v931_v59 = vadd.f32 %v930_v48, %v929_v43 }
 0x7b6   :  { %v1353_v63 = vrot.slane %v1352_v61, 1 }
 0x7b8   :  { %v1354_v2 = vadd.f32 %v1353_v63, %v1352_v61 }
 0x880   :  { %v1784_v0 = vpop.f32.mrb[12].mxu0 }
 0x881   :  { %v1431_v1 = vmul.f32 2.0, %v1784_v0  ;;  %v1421_v3 = vpop.f32.mrb[13].mxu0 }
 0x882   :  { %v1430_v4 = vmul.f32 2.0, %v1421_v3 }
 0x883   :  { %v1433_v5 = vsub.f32 %v1354_v2, %v1431_v1  ;;  %v932_v1 = vrot.slane %v931_v59, 1 }
 0x884   :  { %v1432_v6 = vsub.f32 %v1354_v2, %v1430_v4 }
 0x885   :  { %v1437_v9 = vsel %vm857_vm1, %v1433_v5, inf  ;;  %v933_v3 = vadd.f32 %v932_v1, %v931_v59 }
 0x886   :  { %v1434_v8 = vsel %vm857_vm1, %v1432_v6, inf }
 0x887   :  { %1435 = vmin.xlane.f32.xlu1 %v1434_v8 }
 0x88b   :  { %1438 = vmin.xlane.f32.xlu1 %v1437_v9 }
 0x914   :  { %v1436_v11 = vpop.xlane.xlu1 %1435 }
 0x915   :  { %vm1440_vm11 = vcmp.le.f32.partialorder %v1432_v6, %v1436_v11 }
 0x916   :  { %v1442_v19 = vsel %vm1440_vm11, %v2270_v62, 8 }
 0x917   :  { %v1444_v12 = vsel %vm857_vm1, %v1442_v19, 2147483647 }
 0x918   :  { %v1439_v13 = vpop.xlane.xlu1 %1438  ;;  %v1446_v14 = vshra.s32 %v1444_v12, 16  ;;  %v1445_v24 = vand.u32 65535, %v1444_v12 }
 0x919   :  { %vm1441_vm12 = vcmp.le.f32.partialorder %v1433_v5, %v1439_v13 }
 0x91a   :  { %v1443_v15 = vsel %vm1441_vm12, %v2270_v62, 8  ;;  %v1448_v16 = vcvt.s32.f32 %v1446_v14  ;;  %v1447_v28 = vcvt.s32.f32 %v1445_v24 }
 0x91b   :  { %v1459_v17 = vsel %vm857_vm1, %v1443_v15, 2147483647 }
 0x91c   :  { %1449 = vmin.xlane.f32.xlu1 %v1448_v16  ;;  %v1461_v18 = vshra.s32 %v1459_v17, 16  ;;  %v1460_v29 = vand.u32 65535, %v1459_v17 }
 0x91e   :  { %v1463_v23 = vcvt.s32.f32 %v1461_v18  ;;  %v1462_v32 = vcvt.s32.f32 %v1460_v29 }
 0x920   :  { %1464 = vmin.xlane.f32.xlu1 %v1463_v23 }
 0x9a9   :  { %v1450_v25 = vpop.xlane.xlu1 %1449 }
 0x9aa   :  { %vm1451_vm13 = vcmp.eq.f32.partialorder %v1448_v16, %v1450_v25  ;;  %v1456_v35 = vcvt.f32.s32 %v1450_v25 }
 0x9ab   :  { %v1452_v30 = vsel %vm1451_vm13, %v1447_v28, inf }
 0x9ac   :  { %1453 = vmin.xlane.f32.xlu1 %v1452_v30  ;;  %v1457_v39 = vshll.u32 %v1456_v35, 16 }
 0x9ad   :  { %v1465_v31 = vpop.xlane.xlu1 %1464 }
 0x9ae   :  { %vm1466_vm14 = vcmp.eq.f32.partialorder %v1463_v23, %v1465_v31  ;;  %v1471_v40 = vcvt.f32.s32 %v1465_v31 }
 0x9af   :  { %v1467_v33 = vsel %vm1466_vm14, %v1462_v32, inf }
 0x9b0   :  { %1468 = vmin.xlane.f32.xlu1 %v1467_v33  ;;  %v1472_v44 = vshll.u32 %v1471_v40, 16 }
 0x9b4   :  { %909 = vadd.xlane.f32.xlu1 %v2246_v55 }
 0xa39   :  { %v1454_v38 = vpop.xlane.xlu1 %1453 }
 0xa3a   :  { %v1455_v54 = vcvt.f32.s32 %v1454_v38 }
 0xa3c   :  { %v1458_v42 = vadd.s32 %v1457_v39, %v1455_v54 }
 0xa3d   :  { %v1469_v58 = vpop.xlane.xlu1 %1468 }
 0xa3e   :  { %vm1474_vm15 = vcmp.eq.s32.totalorder %v2270_v62, %v1458_v42  ;;  %v1470_v55 = vcvt.f32.s32 %v1469_v58 }
 0xa3f   :  { %v1612_v20 = vsel %vm1474_vm15, 1.0, %v1927_v26 }
 0xa40   :  { %v1473_v45 = vadd.s32 %v1472_v44, %v1470_v55  ;;  %v1480_v47 = vmul.f32 %v1612_v20, %v2236_v27 }
 0xa41   :  { %v910_v49 = vpop.xlane.xlu1 %909 }
 0xa42   :  { %vm1475_vm0 = vcmp.eq.s32.totalorder %v2270_v62, %v1473_v45  ;;  %v911_v50 = vrot.slane %v910_v49, 4  ;;  %v1482_v51 = vmul.f32 %v1480_v47, %v884_v46 }
 0xa43   :  { %v1613_v52 = vsel %vm1475_vm0, 1.0, %v1927_v26 }
 0xa44   :  { %v1481_v53 = vmul.f32 0.0, %v1613_v52  ;;  %v912_v56 = vadd.f32 %v911_v50, %v910_v49  ;;  %v1484_v63 = vsel %vm857_vm1, %v1482_v51, 0.0 }
 0xa46   :  { %v913_v60 = vrot.slane %v912_v56, 2  ;;  %v1483_v61 = vmul.f32 %v1481_v53, %v885_v21 }
 0xa48   :  { %v1485_v7 = vsel %vm857_vm1, %v1483_v61, 0.0  ;;  %v914_v27 = vadd.f32 %v913_v60, %v912_v56 }
 0xa49   :  { %v1486_v0 = vadd.f32 %v1485_v7, %v1484_v63 }
 0xa4a   :  { %v915_v2 = vrot.slane %v914_v27, 1 }
 0xa4b   :  { %1487 = vadd.xlane.f32.xlu1 %v1486_v0 }
 0xa4c   :  { %v916_v62 = vadd.f32 %v915_v2, %v914_v27 }
 0xa4e   :  { %1817 = vpush %v916_v62 }
 0xa4f   :  { %1819 = vpush %v933_v3 }
 0xa7f   :  { %s1818_s4 = spop %1817 }
 0xa80   :  { %s918_s5 = ssub.f32 0.0, %s1818_s4  ;;  %s1820_s9 = spop %1819 }
 0xa82   :  { %s919_s11 = smul.f32 0.5, %s918_s5 }
 0xa84   :  { %s935_s14 = sadd.f32 %s1820_s9, %s919_s11 }
 0xad8   :  { %v1488_v26 = vpop.xlane.xlu1 %1487 }
 0xad9   :  { %v1489_v4 = vrot.slane %v1488_v26, 4 }
 0xadb   :  { %v1490_v5 = vadd.f32 %v1489_v4, %v1488_v26 }
 0xadd   :  { %v1491_v10 = vrot.slane %v1490_v5, 2 }
 0xadf   :  { %v1492_v6 = vadd.f32 %v1491_v10, %v1490_v5 }
 0xae1   :  { %v1493_v8 = vrot.slane %v1492_v6, 1 }
 0xae3   :  { %v1494_v9 = vadd.f32 %v1493_v8, %v1492_v6 }
 0xae5   :  { %1821 = vpush %v1494_v9 }
 0xb16   :  { %s1822_s10 = spop %1821 }
 0xb17   :  { %s1496_s12 = ssub.f32 0.0, %s1822_s10 }
 0xb19   :  { %s1497_s13 = smul.f32 0.5, %s1496_s12 }
 0xb1b   :  { %s1498_s15 = smul.f32 0.3, %s1497_s13 }
 0xb1d   :  { %s1499_s16 = sadd.f32 %s1498_s15, %s935_s14 }
 0xb1f   :  { %1503 = sst [smem:[#allocation2]] %s1499_s16 }
 0xb20   :  { %1924 = shalt.err (!%p1921_p2)
}
 0xb21   :  { %s1928_s23 = smov [#allocation2]  }
 0xb22   :  { %1513 = dma.smem_to_hbm %s1928_s23, 16, %s2331_s6, [#allocation3]  }
 0xb23   :  { %1925 = dma.done.wait [#allocation3], 16  }
 0xb24   :  { %1926 = vsyncadd [#allocation3], 4294967280 }
 0xb25   :  { %1519 = sfence }
 0xb26   :  { %1520 = vsyncpa [#allocation3], 1 }

</bundles_post_ra>
